<compile_context>
chip_gen: v5e
topology: v5e:2x2
jax: 0.10.0
libtpu: 0.0.40
codegen_flags: <defaults>
</compile_context>

<pallas_src>
import functools

import jax
import jax.numpy as jnp
import numpy as np
from jax.experimental import pallas as pl
from jax.experimental.pallas import tpu as pltpu


def _round_up(x, m):
    return ((x + m - 1) // m) * m


def _cdiv(a, b):
    return -(-a // b)


def _vmem_block_bytes(rows, cols, itemsize=4):
    # (8,128)-tiled VMEM footprint of one buffer of a (rows, cols) block.
    return _round_up(rows, 8) * _round_up(cols, 128) * itemsize


def _layer_matmul_kernel(w_ref, x_ref, out_u_ref, out_o_ref):
    # w_ref : (2*tm, K2)  per-node-tile interleave [under-rows ; over-rows]
    #          under row = [w_neg | w_pos | bias], over row = [w_pos | w_neg | bias]
    # x_ref : (K2, tp)    shared RHS [Over ; Under ; ones-row] (bias folded in)
    # One fused MXU dot per grid step; rows are split-stored to the two
    # lane-dense output tiles (no post-kernel de-interleave copy).
    tm = out_u_ref.shape[0]
    res = jnp.dot(w_ref[...], x_ref[...], preferred_element_type=jnp.float32)
    out_u_ref[...] = res[:tm, :]
    out_o_ref[...] = res[tm:, :]


@functools.partial(jax.jit, static_argnames=("n_vars", "node_tile", "p_tile"))
def _layer_forward(under_polys, over_polys, udeg, odeg, w_pos, w_neg, biases,
                   *, n_vars, node_tile, p_tile):
    n_in = len(under_polys)
    D = under_polys[0].shape[1]
    P = n_vars * D
    n_nodes = w_pos.shape[0]

    U = jnp.stack([p.reshape(P) for p in under_polys], 0).astype(jnp.float32)
    O = jnp.stack([p.reshape(P) for p in over_polys], 0).astype(jnp.float32)
    udeg = udeg.astype(jnp.float32)
    odeg = odeg.astype(jnp.float32)

    # ---- fused LHS / RHS: bias folded via ones-row appended to X ----------
    K2 = 2 * n_in + 1
    W_u = jnp.concatenate([w_neg, w_pos, biases], axis=1)   # (n_nodes, K2)
    W_o = jnp.concatenate([w_pos, w_neg, biases], axis=1)   # (n_nodes, K2)
    X = jnp.concatenate([O, U, jnp.ones((1, P), jnp.float32)], axis=0)

    # ---- node tiling: minimise padded rows ---------------------------------
    num_n = _cdiv(n_nodes, node_tile)
    tm = _round_up(_cdiv(n_nodes, num_n), 8)
    n_tiles = _cdiv(n_nodes, tm)
    n_pad = n_tiles * tm

    # ---- coeff tiling: pad only to the next multiple of 128 ----------------
    P128 = _round_up(P, 128)
    num_p = _cdiv(P128, p_tile)
    tp = _round_up(_cdiv(P128, num_p), 128)
    p_tiles = _cdiv(P128, tp)
    P_pad = p_tiles * tp

    # ---- guarantee >=2 parallel blocks where possible (v7x has 2 TCs) ------
    if n_tiles * p_tiles == 1:
        if P128 >= 256:
            tp = _round_up(_cdiv(P128, 2), 128)
            p_tiles = _cdiv(P128, tp)
            P_pad = p_tiles * tp
        elif n_nodes >= 16:
            tm = _round_up(_cdiv(n_nodes, 2), 8)
            n_tiles = _cdiv(n_nodes, tm)
            n_pad = n_tiles * tm

    # ---- pad operands (zero rows/cols only; sliced off afterwards) ---------
    if n_pad != n_nodes:
        z = jnp.zeros((n_pad - n_nodes, K2), jnp.float32)
        W_u = jnp.concatenate([W_u, z], axis=0)
        W_o = jnp.concatenate([W_o, z], axis=0)
    if P_pad != P:
        X = jnp.concatenate([X, jnp.zeros((K2, P_pad - P), jnp.float32)], axis=1)

    # per-tile interleave: rows [j*2*tm, j*2*tm+tm) = under, next tm = over
    W_all = jnp.stack(
        [W_u.reshape(n_tiles, tm, K2), W_o.reshape(n_tiles, tm, K2)],
        axis=1).reshape(2 * n_pad, K2)

    # ---- grid order: re-fetch whichever operand costs fewer bytes ----------
    extra_w_refetch = 2 * n_pad * K2 * (p_tiles - 1)  # if p is the OUTER axis
    extra_x_refetch = K2 * P_pad * (n_tiles - 1)      # if p is the INNER axis
    if extra_w_refetch <= extra_x_refetch:
        grid = (p_tiles, n_tiles)
        w_map = lambda p, j: (j, 0)
        x_map = lambda p, j: (0, p)
        o_map = lambda p, j: (j, p)
    else:
        grid = (n_tiles, p_tiles)
        w_map = lambda j, p: (j, 0)
        x_map = lambda j, p: (0, p)
        o_map = lambda j, p: (j, p)

    # ---- VMEM budget (double-buffered) & compiler params --------------------
    vmem_est = 2 * (_vmem_block_bytes(2 * tm, K2)
                    + _vmem_block_bytes(K2, tp)
                    + 2 * _vmem_block_bytes(tm, tp))
    vmem_limit = min(max(int(vmem_est * 1.5), 32 * 1024 * 1024),
                     48 * 1024 * 1024)

    out_u_pad, out_o_pad = pl.pallas_call(
        _layer_matmul_kernel,
        out_shape=(jax.ShapeDtypeStruct((n_pad, P_pad), jnp.float32),
                   jax.ShapeDtypeStruct((n_pad, P_pad), jnp.float32)),
        grid_spec=pltpu.PrefetchScalarGridSpec(
            num_scalar_prefetch=0,
            grid=grid,
            in_specs=[
                pl.BlockSpec((2 * tm, K2), w_map),   # fused W (under+over rows)
                pl.BlockSpec((K2, tp), x_map),       # shared RHS
            ],
            out_specs=[
                pl.BlockSpec((tm, tp), o_map),       # under coeffs
                pl.BlockSpec((tm, tp), o_map),       # over coeffs
            ]),
        compiler_params=pltpu.CompilerParams(
            dimension_semantics=("parallel", "parallel"),
            vmem_limit_bytes=vmem_limit),
    )(W_all, X)

    if n_pad != n_nodes or P_pad != P:
        out_u_pad = out_u_pad[:n_nodes, :P]
        out_o_pad = out_o_pad[:n_nodes, :P]
    out_u = out_u_pad.reshape(n_nodes, n_vars, D)
    out_o = out_o_pad.reshape(n_nodes, n_vars, D)

    # ---- degree bookkeeping: grid-invariant masked max, plain JAX (fused) ---
    # (mirrors the exact-zero input / zero-weight skip logic in
    #  ibf_tensor_prod_input_weights; degrees are non-negative)
    u_nz = jnp.max(jnp.abs(U), axis=1) > 0.0        # (n_in,)
    o_nz = jnp.max(jnp.abs(O), axis=1) > 0.0
    wp_nz = jnp.abs(w_pos) > 0.0                    # (n_nodes, n_in)
    wn_nz = jnp.abs(w_neg) > 0.0
    dg_u = jnp.maximum(
        jnp.where((wn_nz & o_nz[None, :])[:, :, None], odeg[None, :, :], 0.0),
        jnp.where((wp_nz & u_nz[None, :])[:, :, None], udeg[None, :, :], 0.0),
    ).max(axis=1)
    dg_o = jnp.maximum(
        jnp.where((wp_nz & o_nz[None, :])[:, :, None], odeg[None, :, :], 0.0),
        jnp.where((wn_nz & u_nz[None, :])[:, :, None], udeg[None, :, :], 0.0),
    ).max(axis=1)

    return out_u, out_o, dg_u, dg_o


class LayerModule:
    """JAX/Pallas port of the torch LayerModule ('linear' activation path)."""

    def __init__(self, n_vars, intervals, layer_weights, layer_biases,
                 layer_size, activation="linear", assume_quadrant=False,
                 node_tile=128, p_tile=4096):
        assert activation == "linear"  # TODO(synk): relu branch not portable
        self.n_vars = n_vars
        self.intervals = intervals
        self.layer_size = layer_size
        self.node_tile = node_tile
        self.p_tile = p_tile
        lw = jnp.asarray(layer_weights, jnp.float32)
        self.w_pos = jnp.maximum(lw, 0.0)                       # relu(W)
        self.w_neg = jnp.minimum(lw, 0.0)                       # -relu(-W)
        self.biases = jnp.asarray(layer_biases, jnp.float32).reshape(layer_size, 1)

    def forward(self, layer_inputs_under, layer_inputs_over,
                layer_inputs_under_degrees, layer_inputs_over_degrees,
                should_linearize=False, rank=0, size=1):
        assert not should_linearize  # TODO(synk): upper/lower_linear_ibf missing

        # distributed chunking over nodes (mirrors rank/size arithmetic)
        chunk_size = self.layer_size // size
        chunk_start = rank * chunk_size
        chunk_end = self.layer_size if rank == size - 1 else chunk_start + chunk_size
        w_pos = self.w_pos[chunk_start:chunk_end]
        w_neg = self.w_neg[chunk_start:chunk_end]
        biases = self.biases[chunk_start:chunk_end]
        n_nodes = chunk_end - chunk_start
        n_vars = self.n_vars
        D = layer_inputs_under[0].shape[1]

        out_u, out_o, dg_u, dg_o = _layer_forward(
            tuple(layer_inputs_under), tuple(layer_inputs_over),
            layer_inputs_under_degrees, layer_inputs_over_degrees,
            w_pos, w_neg, biases,
            n_vars=n_vars, node_tile=self.node_tile, p_tile=self.p_tile)

        # stacked slabs (same data as the torch per-node lists; index to split)
        return (out_u.reshape(n_nodes, n_vars, D),
                out_o.reshape(n_nodes, n_vars, D),
                dg_u, dg_o)


if __name__ == "__main__":
    n_vars, D, n_in, layer_size = 8, 16, 8, 16
    P = n_vars * D

    key = jax.random.PRNGKey(0)
    k = jax.random.split(key, 8)

    under_list = [jax.random.normal(jax.random.fold_in(k[0], i), (n_vars, D),
                                    jnp.float32) for i in range(n_in)]
    over_list = [under_list[i]
                 + jnp.abs(jax.random.normal(jax.random.fold_in(k[1], i),
                                             (n_vars, D), jnp.float32))
                 for i in range(n_in)]
    # one identically-zero input exercises the zero-polynomial skip logic
    under_list[3] = jnp.zeros((n_vars, D), jnp.float32)

    under_degrees = jax.random.randint(k[2], (n_in, n_vars), 0, 4).astype(jnp.float32)
    over_degrees = jax.random.randint(k[3], (n_in, n_vars), 0, 4).astype(jnp.float32)

    W = jax.random.normal(k[4], (layer_size, n_in), jnp.float32)
    W = W * (jax.random.uniform(k[5], (layer_size, n_in)) > 0.3).astype(jnp.float32)
    bias = jax.random.normal(k[6], (layer_size,), jnp.float32)
    intervals = jnp.stack([-jnp.ones(n_vars), jnp.ones(n_vars)], axis=1)

    layer = LayerModule(n_vars, intervals, W, bias, layer_size,
                        activation="linear", assume_quadrant=False)
    res_u, res_o, deg_u, deg_o = layer.forward(
        under_list, over_list, under_degrees, over_degrees,
        should_linearize=False, rank=0, size=1)
    jax.block_until_ready((res_u, res_o, deg_u, deg_o))

    # ---- plain-numpy reference check ----
    Wn_ = np.asarray(W)
    Wp = np.maximum(Wn_, 0.0)
    Wn = np.minimum(Wn_, 0.0)
    Unp = np.stack([np.asarray(p).reshape(P) for p in under_list])
    Onp = np.stack([np.asarray(p).reshape(P) for p in over_list])
    bnp = np.asarray(bias)[:, None]
    ref_u = Wn @ Onp + Wp @ Unp + bnp
    ref_o = Wp @ Onp + Wn @ Unp + bnp

    udeg_np = np.asarray(under_degrees)
    odeg_np = np.asarray(over_degrees)
    u_nz = np.abs(Unp).max(axis=1) > 0
    o_nz = np.abs(Onp).max(axis=1) > 0
    ref_du = np.zeros((layer_size, n_vars), np.float32)
    ref_do = np.zeros((layer_size, n_vars), np.float32)
    for j in range(layer_size):
        for i in range(n_in):
            if abs(Wn[j, i]) > 0 and o_nz[i]:
                ref_du[j] = np.maximum(ref_du[j], odeg_np[i])
            if abs(Wp[j, i]) > 0 and u_nz[i]:
                ref_du[j] = np.maximum(ref_du[j], udeg_np[i])
            if abs(Wp[j, i]) > 0 and o_nz[i]:
                ref_do[j] = np.maximum(ref_do[j], odeg_np[i])
            if abs(Wn[j, i]) > 0 and u_nz[i]:
                ref_do[j] = np.maximum(ref_do[j], udeg_np[i])

    got_u = np.asarray(res_u).reshape(layer_size, P)
    got_o = np.asarray(res_o).reshape(layer_size, P)
    got_du = np.asarray(deg_u)
    got_do = np.asarray(deg_o)

    np.testing.assert_allclose(got_u, ref_u, rtol=1e-5, atol=1e-5)
    np.testing.assert_allclose(got_o, ref_o, rtol=1e-5, atol=1e-5)
    np.testing.assert_allclose(got_du, ref_du, rtol=0, atol=0)
    np.testing.assert_allclose(got_do, ref_do, rtol=0, atol=0)

    print("KERNEL_OK")
</pallas_src>

<mosaic_0001>
module attributes {stable_mosaic.version = 11 : i64} {
  func.func @_layer_matmul_kernel(%arg0: i32, %arg1: i32, %arg2: memref<16x17xf32, #tpu.memory_space<vmem>>, %arg3: memref<17x128xf32, #tpu.memory_space<vmem>>, %arg4: memref<8x128xf32, #tpu.memory_space<vmem>>, %arg5: memref<8x128xf32, #tpu.memory_space<vmem>>) attributes {dimension_semantics = [#tpu.dimension_semantics<parallel>, #tpu.dimension_semantics<parallel>], iteration_bounds = array<i64: 1, 2>, scalar_prefetch = 0 : i64, scratch_operands = 0 : i64, tpu.core_type = #tpu.core_type<tc>, window_params = [{transform_indices = @transform_0, window_bounds = array<i64: 16, 17>}, {transform_indices = @transform_1, window_bounds = array<i64: 17, 128>}, {transform_indices = @transform_2, window_bounds = array<i64: 8, 128>}, {transform_indices = @transform_3, window_bounds = array<i64: 8, 128>}]} {
    %c0 = arith.constant 0 : index
    %c0_0 = arith.constant 0 : index
    %0 = vector.load %arg2[%c0, %c0_0] : memref<16x17xf32, #tpu.memory_space<vmem>>, vector<16x17xf32>
    %c0_1 = arith.constant 0 : index
    %c0_2 = arith.constant 0 : index
    %1 = vector.load %arg3[%c0_1, %c0_2] : memref<17x128xf32, #tpu.memory_space<vmem>>, vector<17x128xf32>
    %cst = arith.constant dense<0.000000e+00> : vector<16x128xf32>
    %2 = tpu.matmul %0, %1, %cst {dimension_numbers = #tpu.dot_dimension_numbers<[1], [0], [0], [1], [0, 0, 1, 1], [], []>} : vector<16x17xf32>, vector<17x128xf32>, vector<16x128xf32> -> vector<16x128xf32>
    %3 = vector.extract_strided_slice %2 {offsets = [0, 0], sizes = [8, 128], strides = [1, 1]} : vector<16x128xf32> to vector<8x128xf32>
    %c0_3 = arith.constant 0 : index
    %c0_4 = arith.constant 0 : index
    %4 = vector.load %arg4[%c0_3, %c0_4] : memref<8x128xf32, #tpu.memory_space<vmem>>, vector<8x128xf32>
    tpu.vector_store %arg4[%c0_3, %c0_4], %3 {strides = array<i32>} : memref<8x128xf32, #tpu.memory_space<vmem>>, vector<8x128xf32>,
    %5 = vector.extract_strided_slice %2 {offsets = [8, 0], sizes = [8, 128], strides = [1, 1]} : vector<16x128xf32> to vector<8x128xf32>
    %c0_5 = arith.constant 0 : index
    %c0_6 = arith.constant 0 : index
    %6 = vector.load %arg5[%c0_5, %c0_6] : memref<8x128xf32, #tpu.memory_space<vmem>>, vector<8x128xf32>
    tpu.vector_store %arg5[%c0_5, %c0_6], %5 {strides = array<i32>} : memref<8x128xf32, #tpu.memory_space<vmem>>, vector<8x128xf32>,
    return
  }
  func.func @transform_0(%arg0: i32, %arg1: i32) -> (i32, i32) {
    %c0_i32 = arith.constant 0 : i32
    %c0_i32_0 = arith.constant 0 : i32
    return %arg1, %c0_i32 : i32, i32
  }
  func.func @transform_1(%arg0: i32, %arg1: i32) -> (i32, i32) {
    %c0_i32 = arith.constant 0 : i32
    %c0_i32_0 = arith.constant 0 : i32
    return %c0_i32, %arg0 : i32, i32
  }
  func.func @transform_2(%arg0: i32, %arg1: i32) -> (i32, i32) {
    %c0_i32 = arith.constant 0 : i32
    return %arg1, %arg0 : i32, i32
  }
  func.func @transform_3(%arg0: i32, %arg1: i32) -> (i32, i32) {
    %c0_i32 = arith.constant 0 : i32
    return %arg1, %arg0 : i32, i32
  }
}

</mosaic_0001>

<bundles_post_ra>
// kernel: _layer_forward.1
= control target key start
LH: loop header
LB: loop body
LE: loop exit
PB: predicated region body
PF: predicated region fallthrough
CT: control target
= control target key end

     0   :  { %s482_s12 = smov 0   ;;  %s484_s13 = smov 0   ;;  %s532_s0 = inlined_call_operand.vmem [shape: f32[32,17], index: 0, kind: input, shape index: {}]   ;;  %s533_s1 = inlined_call_operand.vmem [shape: f32[17,128], index: 1, kind: input, shape index: {}]   ;;  %s534_s2 = inlined_call_operand.vmem [shape: f32[16,128], index: 2, kind: output, shape index: {0}]   ;;  %s535_s3 = inlined_call_operand.vmem [shape: f32[16,128], index: 3, kind: output, shape index: {1}]  }
   0x1   :  { %s486_s14 = smov 0  }
   0x2 LB: > { %s23_s15 = sadd.s32 1, %s456_s13  ;;  %p401_p0 = scmp.ge.s32.totalorder %s460_s14, 1  ;;  %s460_s14 = sphi %s486_s14, %s14_s14   ;;  %s456_s13 = sphi %s484_s13, %s537_s13   ;;  %s452_s12 = sphi %s482_s12, %s536_s12  }
   0x3   : > { %p24_p1 = scmp.ge.s32.totalorder %s23_s15, 2  ;;  %p166_p2 = scmp.lt.s32.totalorder %s460_s14, 3 }
   0x5   : > { %s539_s15 = smov (%p24_p1, %s23_s15), 0  ;;  %p167_p3 = pnand %p401_p0, %p166_p2 }
   0x6   : > { %s402_s20 = sshll.u32 (!%p167_p3), %s452_s12, 1  ;;  %p213_p5 = scmp.lt.s32.totalorder (!%p167_p3), %s452_s12, 1 }
   0x7   : > { %170 = sbr.rel (%p167_p3) target bundleno = 146 (0x92), region = 28  ;;  %p204_p4 = scmp.lt.s32.totalorder (!%p167_p3), %s402_s20, 3 }
   0xc   : > { %v231_v0 = vld [vmem:[%s533_s1 + $0x10] sm:$0x1]  ;;  %vm239_vm0 = vcmask 1040384   ;;  %v230_v1 = vld [vmem:[%s533_s1 + $0x8] sm:$0xff]  ;;  %v229_v2 = vld [vmem:[%s533_s1] sm:$0xff]  ;;  %s541_s20 = smov (!%p204_p4, %s402_s20), 3 }
   0xd   : > { %406 = vmatpush.msk.msra.mxu0 %vm239_vm0, %v231_v0  ;;  %411 = vmatpush.msk.msra.mxu1 %vm239_vm0, %v231_v0  ;;  %s403_s23 = sshll.u32 %s541_s20, 3  ;;  %vm232_vm1 = vcmask 138240   ;;  %s543_s12 = smov (!%p213_p5, %s452_s12), 1 }
   0xe   : > { %s207_s26 = scalar_lea.vmem %s532_s0, %s403_s23  ;;  %s404_s27 = sshll.u32 %s543_s12, 3 }
   0xf   : > { %257 = vmatpush.msra.mxu0 %v230_v1  ;;  %412 = vmatpush.msra.mxu1 %v230_v1  ;;  %v227_v3 = vld [vmem:[%s207_s26] sm:$0xff]  ;;  %v228_v4 = vld [vmem:[%s207_s26 + $0x8] sm:$0xff]  ;;  %s219_s30 = scalar_lea.vmem %s534_s2, %s404_s27  ;;  %s226_s6 = scalar_lea.vmem %s535_s3, %s404_s27 }
  0x11   : > { %258 = vmatpush.msra.mxu0 %v229_v2  ;;  %413 = vmatpush.msra.mxu1 %v229_v2 }
  0x12   : > { %407 = vmatmul.msk.f32.vlgmr.msra.gmra.mxu0 %vm232_vm1, %v227_v3  ;;  %408 = vmatmul.msk.f32.vlgmr.msra.gmra.mxu1 %vm232_vm1, %v228_v4 }
  0x8f   : > { %v260_v5 = vpop.f32.mrf.mxu0  ;;  %v263_v6 = vpop.f32.mrf.mxu1 }
  0x90   : > { %266 = vst [vmem:[%s219_s30] sm:$0xff] %v260_v5 }
  0x91   : > { %267 = vst [vmem:[%s226_s6] sm:$0xff] %v263_v6 }
  0x92 PF: > { %s14_s14 = sadd.s32 1, %s460_s14   ;;  %s536_s12 = smov %s456_s13 }
  0x93   : > { %p11_p6 = scmp.ge.s32.totalorder %s14_s14, 4   ;;  %s537_s13 = smov %s539_s15 }
  0x95   :  { %13 = sbr.rel (!%p11_p6) target bundleno = 2 (0x2), region = 73 }

</bundles_post_ra>
